<compile_context>
chip_gen: v5e
topology: v5e:2x2
jax: 0.10.0
libtpu: 0.0.40
codegen_flags: <defaults>
</compile_context>

<pallas_src>
import jax
import jax.numpy as jnp
from jax.experimental import pallas as pl
from jax.experimental.pallas import tpu as pltpu

_IN_FEATURES = 28 * 28   # 784
_HIDDEN = 128


def _odd_even_kernel(x_ref, w1_ref, b1_ref, w2_ref, b2_ref, o_ref):
    # fc1 on the MXU: cast operands to bf16 in-register (no separate XLA
    # pad/cast pass over HBM), accumulate in f32.  K = 784 is not a multiple
    # of 128; Mosaic zero-masks the ragged last lane tile of the contraction.
    x = x_ref[...].astype(jnp.bfloat16)
    w1 = w1_ref[...].astype(jnp.bfloat16)
    h = jnp.dot(x, w1, preferred_element_type=jnp.float32)
    # Bias + ReLU in f32 on the VPU (v5e VPU has no bf16 arithmetic).
    h = jnp.maximum(h + b1_ref[...], 0.0)
    # fc2 (128 -> 1): VPU multiply + lane reduction instead of a degenerate
    # 1-column MXU matmul.  w2_ref is a (1, 128) row vector.
    out = jnp.sum(h * w2_ref[...], axis=-1, keepdims=True)
    # b2 is a scalar living in SMEM.
    o_ref[...] = (out + b2_ref[0, 0]).astype(o_ref.dtype)


def _round_up(n, m):
    return -(-n // m) * m


def _pick_batch_tile(batch, tm):
    """Batch tile: big enough to amortize the ~0.35us per-grid-step overhead,
    small enough that large batches keep ~8 grid steps (v7x megacore sharding
    + double-buffer prefetch), and a multiple of 16 (bf16 sublane packing)."""
    tm = max(16, _round_up(tm, 16))
    if batch <= 256:
        # Tiny batch: a single tile covers everything (boundary block is
        # partially filled; Pallas masks the out-of-range rows).
        return min(_round_up(batch, 16), tm)
    target = _round_up(-(-batch // 8), 128)   # aim for ~8 grid steps
    return max(128, min(tm, target))


def odd_even_net(x, w1, b1, w2, b2, *, tm=1024):
    """Forward pass of OddEvenNet.

    Args:
      x:  (B, 1, 28, 28) float32 (or bfloat16), NCHW like PyTorch.
      w1: (784, 128) float32   (fc1 weight stored as (in, out): y = x @ w1 + b1)
      b1: (128,)     float32
      w2: (128, 1)   float32   (fc2 weight stored as (in, out))
      b2: (1,)       float32
      tm: max batch tile size (memory-bound kernel: bigger is better on all
          generations; 1024 default, 2048 also fits the raised VMEM limit).
    Returns:
      (B, 1) float32 logits.
    """
    B = x.shape[0]
    x_flat = x.reshape(B, _IN_FEATURES)          # nn.Flatten (C=1, row-major)

    bm = _pick_batch_tile(B, tm)
    grid = (pl.cdiv(B, bm),)                     # boundary block may be partial

    b1_2d = b1.reshape(1, _HIDDEN).astype(jnp.float32)
    w2_row = w2.reshape(1, _HIDDEN).astype(jnp.float32)
    b2_2d = b2.reshape(1, 1).astype(jnp.float32)

    out = pl.pallas_call(
        _odd_even_kernel,
        out_shape=jax.ShapeDtypeStruct((B, 1), jnp.float32),
        grid_spec=pltpu.PrefetchScalarGridSpec(
            num_scalar_prefetch=0,
            grid=grid,
            in_specs=[
                # x: one (bm, 784) tile per grid step (double-buffered).
                # 784 equals the array's full last dim, so no K padding needed.
                pl.BlockSpec((bm, _IN_FEATURES), lambda i: (i, 0)),
                # Weights / biases: constant index_map -> DMA'd once,
                # VMEM-resident across all grid steps.
                pl.BlockSpec((_IN_FEATURES, _HIDDEN), lambda i: (0, 0)),
                pl.BlockSpec((1, _HIDDEN), lambda i: (0, 0)),
                pl.BlockSpec((1, _HIDDEN), lambda i: (0, 0)),
                # b2: scalar in SMEM (no padded VMEM tile).
                pl.BlockSpec((1, 1), lambda i: (0, 0),
                             memory_space=pltpu.SMEM),
            ],
            out_specs=pl.BlockSpec((bm, 1), lambda i: (i, 0)),
        ),
        compiler_params=pltpu.CompilerParams(
            # Batch axis is embarrassingly parallel (uses both TCs on v7x).
            dimension_semantics=("parallel",),
            # Covers double-buffered f32 x tiles up to tm=2048 even under
            # v5e's 16 MiB default scoped-VMEM limit; safe on v6e/v7x too.
            vmem_limit_bytes=32 * 1024 * 1024,
        ),
    )(x_flat, w1, b1_2d, w2_row, b2_2d)
    return out


def _ref_forward_f32(x, w1, b1, w2, b2):
    """Pure-JAX f32 reference (mirrors the PyTorch module)."""
    B = x.shape[0]
    h = x.reshape(B, _IN_FEATURES) @ w1 + b1
    h = jnp.maximum(h, 0.0)
    return h @ w2 + b2


def _ref_forward_bf16(x, w1, b1, w2, b2):
    """Reference with the same bf16 fc1 operands as the kernel."""
    B = x.shape[0]
    xb = x.reshape(B, _IN_FEATURES).astype(jnp.bfloat16)
    wb = w1.astype(jnp.bfloat16)
    h = jnp.dot(xb, wb, preferred_element_type=jnp.float32) + b1
    h = jnp.maximum(h, 0.0)
    return h @ w2 + b2


if __name__ == "__main__":
    key = jax.random.PRNGKey(0)
    k_x, k_w1, k_b1, k_w2, k_b2 = jax.random.split(key, 5)

    B = 8
    # MNIST-like input, NCHW just as PyTorch would feed it.
    x = jax.random.normal(k_x, (B, 1, 28, 28), dtype=jnp.float32)

    # Deterministic synthetic parameters (shapes from nn.Linear in __init__),
    # stored as (in_features, out_features) so the forward is x @ W + b.
    w1 = jax.random.normal(k_w1, (_IN_FEATURES, _HIDDEN), dtype=jnp.float32) * 0.02
    b1 = jax.random.normal(k_b1, (_HIDDEN,), dtype=jnp.float32) * 0.02
    w2 = jax.random.normal(k_w2, (_HIDDEN, 1), dtype=jnp.float32) * 0.02
    b2 = jax.random.normal(k_b2, (1,), dtype=jnp.float32) * 0.02

    fwd = jax.jit(odd_even_net)
    out = jax.block_until_ready(fwd(x, w1, b1, w2, b2))
    ref_f32 = jax.block_until_ready(_ref_forward_f32(x, w1, b1, w2, b2))
    ref_bf16 = jax.block_until_ready(_ref_forward_bf16(x, w1, b1, w2, b2))

    assert out.shape == (B, 1), out.shape
    # Tight check against a reference with identical bf16 fc1 operands.
    assert jnp.allclose(out, ref_bf16, atol=1e-3, rtol=1e-3), \
        "mismatch vs bf16-operand reference"
    # Loose check against the full-f32 PyTorch-equivalent reference
    # (tolerance widened because fc1 operands are bf16 in the kernel).
    assert jnp.allclose(out, ref_f32, atol=1e-2, rtol=1e-2), \
        "mismatch vs f32 reference"
    print("KERNEL_OK")
</pallas_src>

<mosaic_0001>
module attributes {stable_mosaic.version = 11 : i64} {
  func.func @_odd_even_kernel(%arg0: i32, %arg1: memref<16x784xf32, #tpu.memory_space<vmem>>, %arg2: memref<784x128xf32, #tpu.memory_space<vmem>>, %arg3: memref<1x128xf32, #tpu.memory_space<vmem>>, %arg4: memref<1x128xf32, #tpu.memory_space<vmem>>, %arg5: memref<1x1xf32, #tpu.memory_space<smem>>, %arg6: memref<16x1xf32, #tpu.memory_space<vmem>>) attributes {dimension_semantics = [#tpu.dimension_semantics<parallel>], iteration_bounds = array<i64: 1>, scalar_prefetch = 0 : i64, scratch_operands = 0 : i64, tpu.core_type = #tpu.core_type<tc>, window_params = [{transform_indices = @transform_0, window_bounds = array<i64: 16, 784>}, {pipeline_mode = #tpu.pipeline_mode<synchronous>, transform_indices = @transform_1, window_bounds = array<i64: 784, 128>}, {pipeline_mode = #tpu.pipeline_mode<synchronous>, transform_indices = @transform_2, window_bounds = array<i64: 1, 128>}, {pipeline_mode = #tpu.pipeline_mode<synchronous>, transform_indices = @transform_3, window_bounds = array<i64: 1, 128>}, {transform_indices = @transform_4, window_bounds = array<i64: 1, 1>}, {transform_indices = @transform_5, window_bounds = array<i64: 16, 1>}]} {
    %c0 = arith.constant 0 : index
    %c0_0 = arith.constant 0 : index
    %0 = vector.load %arg1[%c0, %c0_0] : memref<16x784xf32, #tpu.memory_space<vmem>>, vector<16x784xf32>
    %1 = arith.truncf %0 : vector<16x784xf32> to vector<16x784xbf16>
    %c0_1 = arith.constant 0 : index
    %c0_2 = arith.constant 0 : index
    %2 = vector.load %arg2[%c0_1, %c0_2] : memref<784x128xf32, #tpu.memory_space<vmem>>, vector<784x128xf32>
    %3 = arith.truncf %2 : vector<784x128xf32> to vector<784x128xbf16>
    %cst = arith.constant dense<0.000000e+00> : vector<16x128xf32>
    %4 = tpu.matmul %1, %3, %cst {dimension_numbers = #tpu.dot_dimension_numbers<[1], [0], [0], [1], [0, 0, 1, 1], [], []>} : vector<16x784xbf16>, vector<784x128xbf16>, vector<16x128xf32> -> vector<16x128xf32>
    %c0_3 = arith.constant 0 : index
    %c0_4 = arith.constant 0 : index
    %5 = vector.load %arg3[%c0_3, %c0_4] : memref<1x128xf32, #tpu.memory_space<vmem>>, vector<1x128xf32>
    %6 = vector.broadcast %5 : vector<1x128xf32> to vector<16x128xf32>
    %7 = arith.addf %4, %6 : vector<16x128xf32>
    %cst_5 = arith.constant 0.000000e+00 : f32
    %8 = vector.broadcast %cst_5 : f32 to vector<16x128xf32>
    %9 = arith.maximumf %7, %8 : vector<16x128xf32>
    %c0_6 = arith.constant 0 : index
    %c0_7 = arith.constant 0 : index
    %10 = vector.load %arg4[%c0_6, %c0_7] : memref<1x128xf32, #tpu.memory_space<vmem>>, vector<1x128xf32>
    %11 = vector.broadcast %10 : vector<1x128xf32> to vector<16x128xf32>
    %12 = arith.mulf %9, %11 : vector<16x128xf32>
    %cst_8 = arith.constant dense<0.000000e+00> : vector<16xf32>
    %13 = vector.multi_reduction <add>, %12, %cst_8 [1] : vector<16x128xf32> to vector<16xf32>
    %14 = vector.shape_cast %13 : vector<16xf32> to vector<16x1xf32>
    %c0_9 = arith.constant 0 : index
    %c0_10 = arith.constant 0 : index
    %15 = memref.load %arg5[%c0_9, %c0_10] : memref<1x1xf32, #tpu.memory_space<smem>>
    %16 = vector.broadcast %15 : f32 to vector<16x1xf32>
    %17 = arith.addf %14, %16 : vector<16x1xf32>
    %c0_11 = arith.constant 0 : index
    %c0_12 = arith.constant 0 : index
    %18 = vector.load %arg6[%c0_11, %c0_12] : memref<16x1xf32, #tpu.memory_space<vmem>>, vector<16x1xf32>
    tpu.vector_store %arg6[%c0_11, %c0_12], %17 {strides = array<i32>} : memref<16x1xf32, #tpu.memory_space<vmem>>, vector<16x1xf32>,
    return
  }
  func.func @transform_0(%arg0: i32) -> (i32, i32) {
    %c0_i32 = arith.constant 0 : i32
    %c0_i32_0 = arith.constant 0 : i32
    return %arg0, %c0_i32 : i32, i32
  }
  func.func @transform_1(%arg0: i32) -> (i32, i32) {
    %c0_i32 = arith.constant 0 : i32
    %c0_i32_0 = arith.constant 0 : i32
    %c0_i32_1 = arith.constant 0 : i32
    return %c0_i32, %c0_i32_0 : i32, i32
  }
  func.func @transform_2(%arg0: i32) -> (i32, i32) {
    %c0_i32 = arith.constant 0 : i32
    %c0_i32_0 = arith.constant 0 : i32
    %c0_i32_1 = arith.constant 0 : i32
    return %c0_i32, %c0_i32_0 : i32, i32
  }
  func.func @transform_3(%arg0: i32) -> (i32, i32) {
    %c0_i32 = arith.constant 0 : i32
    %c0_i32_0 = arith.constant 0 : i32
    %c0_i32_1 = arith.constant 0 : i32
    return %c0_i32, %c0_i32_0 : i32, i32
  }
  func.func @transform_4(%arg0: i32) -> (i32, i32) {
    %c0_i32 = arith.constant 0 : i32
    %c0_i32_0 = arith.constant 0 : i32
    %c0_i32_1 = arith.constant 0 : i32
    return %c0_i32, %c0_i32_0 : i32, i32
  }
  func.func @transform_5(%arg0: i32) -> (i32, i32) {
    %c0_i32 = arith.constant 0 : i32
    %c0_i32_0 = arith.constant 0 : i32
    return %arg0, %c0_i32 : i32, i32
  }
}

</mosaic_0001>

<bundles_post_ra>
// kernel: odd_even_net.1
= control target key start
LH: loop header
LB: loop body
LE: loop exit
PB: predicated region body
PF: predicated region fallthrough
CT: control target
= control target key end

     0   :  { %vm194_vm0 = vcmask 130048   ;;  %vm312_vm1 = vcmask 7168   ;;  %s737_s0 = inlined_call_operand.vmem [shape: f32[8,784], index: 0, kind: input, shape index: {}]   ;;  %s738_s1 = inlined_call_operand.vmem [shape: f32[784,128], index: 1, kind: input, shape index: {}]   ;;  %s739_s2 = inlined_call_operand.vmem [shape: f32[1,128], index: 2, kind: input, shape index: {}]   ;;  %s740_s3 = inlined_call_operand.vmem [shape: f32[1,128], index: 3, kind: input, shape index: {}]   ;;  %s741_s4 = inlined_call_operand.<no memory space> [shape: f32[1,1], index: 4, kind: input, shape index: {}]   ;;  %s742_s5 = inlined_call_operand.vmem [shape: f32[8,1], index: 5, kind: output, shape index: {}]  }
   0x1   :  { %v57_v0 = vld [vmem:[%s738_s1 + $0x70] sm:$0xff]  ;;  %v58_v1 = vld [vmem:[%s738_s1 + $0x78] sm:$0xff]  ;;  %v55_v9 = vld [vmem:[%s738_s1 + $0x60] sm:$0xff] }
   0x2   :  { %v73_v2 = vld [vmem:[%s738_s1 + $0xf0] sm:$0xff]  ;;  %v148_v3 = vpack.c.bf16 %v58_v1, %v57_v0  ;;  %v74_v4 = vld [vmem:[%s738_s1 + $0xf8] sm:$0xff]  ;;  %v56_v10 = vld [vmem:[%s738_s1 + $0x68] sm:$0xff] }
   0x3   :  { %v89_v5 = vld [vmem:[%s738_s1 + $0x170] sm:$0xff]  ;;  %v90_v6 = vld [vmem:[%s738_s1 + $0x178] sm:$0xff]  ;;  %v156_v7 = vpack.c.bf16 %v74_v4, %v73_v2  ;;  %v71_v11 = vld [vmem:[%s738_s1 + $0xe0] sm:$0xff]  ;;  %v147_v12 = vpack.c.bf16 %v56_v10, %v55_v9 }
   0x4   :  { %v164_v8 = vpack.c.bf16 %v90_v6, %v89_v5  ;;  %198 = vmatpush.bf16.msra.mxu0 %v148_v3  ;;  %v72_v13 = vld [vmem:[%s738_s1 + $0xe8] sm:$0xff]  ;;  %v105_v14 = vld [vmem:[%s738_s1 + $0x1f0] sm:$0xff]  ;;  %v106_v15 = vld [vmem:[%s738_s1 + $0x1f8] sm:$0xff] }
   0x5   :  { %212 = vmatpush.bf16.msra.mxu1 %v156_v7  ;;  %v155_v16 = vpack.c.bf16 %v72_v13, %v71_v11  ;;  %v172_v17 = vpack.c.bf16 %v106_v15, %v105_v14  ;;  %v87_v18 = vld [vmem:[%s738_s1 + $0x160] sm:$0xff]  ;;  %v88_v19 = vld [vmem:[%s738_s1 + $0x168] sm:$0xff]  ;;  %v53_v20 = vld [vmem:[%s738_s1 + $0x50] sm:$0xff] }
   0x6   :  { %226 = vmatpush.bf16.msra.mxu2 %v164_v8  ;;  %v163_v21 = vpack.c.bf16 %v88_v19, %v87_v18  ;;  %v54_v22 = vld [vmem:[%s738_s1 + $0x58] sm:$0xff]  ;;  %v69_v23 = vld [vmem:[%s738_s1 + $0xd0] sm:$0xff]  ;;  %v103_v25 = vld [vmem:[%s738_s1 + $0x1e0] sm:$0xff] }
   0x7   :  { %v70_v24 = vld [vmem:[%s738_s1 + $0xd8] sm:$0xff]  ;;  %240 = vmatpush.bf16.msra.mxu3 %v172_v17  ;;  %v104_v26 = vld [vmem:[%s738_s1 + $0x1e8] sm:$0xff]  ;;  %v85_v27 = vld [vmem:[%s738_s1 + $0x150] sm:$0xff]  ;;  %v146_v28 = vpack.c.bf16 %v54_v22, %v53_v20 }
   0x8   :  { %199 = vmatpush.bf16.msra.mxu0 %v147_v12  ;;  %v171_v29 = vpack.c.bf16 %v104_v26, %v103_v25  ;;  %v86_v30 = vld [vmem:[%s738_s1 + $0x158] sm:$0xff]  ;;  %v51_v31 = vld [vmem:[%s738_s1 + $0x40] sm:$0xff]  ;;  %v52_v32 = vld [vmem:[%s738_s1 + $0x48] sm:$0xff]  ;;  %v154_v33 = vpack.c.bf16 %v70_v24, %v69_v23 }
   0x9   :  { %213 = vmatpush.bf16.msra.mxu1 %v155_v16  ;;  %v162_v34 = vpack.c.bf16 %v86_v30, %v85_v27  ;;  %v67_v35 = vld [vmem:[%s738_s1 + $0xc0] sm:$0xff]  ;;  %v68_v36 = vld [vmem:[%s738_s1 + $0xc8] sm:$0xff]  ;;  %v101_v37 = vld [vmem:[%s738_s1 + $0x1d0] sm:$0xff]  ;;  %v145_v42 = vpack.c.bf16 %v52_v32, %v51_v31 }
   0xa   :  { %227 = vmatpush.bf16.msra.mxu2 %v163_v21  ;;  %v102_v38 = vld [vmem:[%s738_s1 + $0x1d8] sm:$0xff]  ;;  %v83_v39 = vld [vmem:[%s738_s1 + $0x140] sm:$0xff]  ;;  %v84_v40 = vld [vmem:[%s738_s1 + $0x148] sm:$0xff]  ;;  %v153_v45 = vpack.c.bf16 %v68_v36, %v67_v35 }
   0xb   :  { %241 = vmatpush.bf16.msra.mxu3 %v171_v29  ;;  %v170_v41 = vpack.c.bf16 %v102_v38, %v101_v37  ;;  %v99_v43 = vld [vmem:[%s738_s1 + $0x1c0] sm:$0xff]  ;;  %v100_v44 = vld [vmem:[%s738_s1 + $0x1c8] sm:$0xff]  ;;  %v161_v46 = vpack.c.bf16 %v84_v40, %v83_v39  ;;  %v49_v47 = vld [vmem:[%s738_s1 + $0x30] sm:$0xff] }
   0xc   :  { %200 = vmatpush.bf16.msra.mxu0 %v146_v28  ;;  %v50_v48 = vld [vmem:[%s738_s1 + $0x38] sm:$0xff]  ;;  %v65_v49 = vld [vmem:[%s738_s1 + $0xb0] sm:$0xff]  ;;  %v169_v53 = vpack.c.bf16 %v100_v44, %v99_v43  ;;  %v47_v59 = vld [vmem:[%s738_s1 + $0x20] sm:$0xff] }
   0xd   :  { %214 = vmatpush.bf16.msra.mxu1 %v154_v33  ;;  %v66_v50 = vld [vmem:[%s738_s1 + $0xb8] sm:$0xff]  ;;  %v81_v51 = vld [vmem:[%s738_s1 + $0x130] sm:$0xff]  ;;  %v144_v54 = vpack.c.bf16 %v50_v48, %v49_v47  ;;  %v48_v60 = vld [vmem:[%s738_s1 + $0x28] sm:$0xff] }
   0xe   :  { %228 = vmatpush.bf16.msra.mxu2 %v162_v34  ;;  %v82_v52 = vld [vmem:[%s738_s1 + $0x138] sm:$0xff]  ;;  %v97_v55 = vld [vmem:[%s738_s1 + $0x1b0] sm:$0xff]  ;;  %v152_v57 = vpack.c.bf16 %v66_v50, %v65_v49  ;;  %v63_v61 = vld [vmem:[%s738_s1 + $0xa0] sm:$0xff]  ;;  %v143_v2 = vpack.c.bf16 %v48_v60, %v47_v59 }
   0xf   :  { %242 = vmatpush.bf16.msra.mxu3 %v170_v41  ;;  %v98_v56 = vld [vmem:[%s738_s1 + $0x1b8] sm:$0xff]  ;;  %v160_v58 = vpack.c.bf16 %v82_v52, %v81_v51  ;;  %v64_v62 = vld [vmem:[%s738_s1 + $0xa8] sm:$0xff]  ;;  %v79_v63 = vld [vmem:[%s738_s1 + $0x120] sm:$0xff] }
  0x10   :  { %201 = vmatpush.bf16.msra.mxu0 %v145_v42  ;;  %v80_v0 = vld [vmem:[%s738_s1 + $0x128] sm:$0xff]  ;;  %v168_v1 = vpack.c.bf16 %v98_v56, %v97_v55  ;;  %v95_v3 = vld [vmem:[%s738_s1 + $0x1a0] sm:$0xff]  ;;  %v151_v5 = vpack.c.bf16 %v64_v62, %v63_v61  ;;  %v45_v7 = vld [vmem:[%s738_s1 + $0x10] sm:$0xff] }
  0x11   :  { %215 = vmatpush.bf16.msra.mxu1 %v153_v45  ;;  %v96_v4 = vld [vmem:[%s738_s1 + $0x1a8] sm:$0xff]  ;;  %v159_v6 = vpack.c.bf16 %v80_v0, %v79_v63  ;;  %v46_v8 = vld [vmem:[%s738_s1 + $0x18] sm:$0xff]  ;;  %v61_v9 = vld [vmem:[%s738_s1 + $0x90] sm:$0xff] }
  0x12   :  { %229 = vmatpush.bf16.msra.mxu2 %v161_v46  ;;  %v62_v10 = vld [vmem:[%s738_s1 + $0x98] sm:$0xff]  ;;  %v77_v11 = vld [vmem:[%s738_s1 + $0x110] sm:$0xff]  ;;  %v167_v13 = vpack.c.bf16 %v96_v4, %v95_v3  ;;  %v43_v14 = vld [vmem:[%s738_s1] sm:$0xff]  ;;  %v142_v16 = vpack.c.bf16 %v46_v8, %v45_v7 }
  0x13   :  { %243 = vmatpush.bf16.msra.mxu3 %v169_v53  ;;  %v78_v12 = vld [vmem:[%s738_s1 + $0x118] sm:$0xff]  ;;  %v44_v15 = vld [vmem:[%s738_s1 + $0x8] sm:$0xff]  ;;  %v59_v17 = vld [vmem:[%s738_s1 + $0x80] sm:$0xff]  ;;  %v150_v20 = vpack.c.bf16 %v62_v10, %v61_v9 }
  0x14   :  { %202 = vmatpush.bf16.msra.mxu0 %v144_v54  ;;  %v93_v18 = vld [vmem:[%s738_s1 + $0x190] sm:$0xff]  ;;  %v94_v19 = vld [vmem:[%s738_s1 + $0x198] sm:$0xff]  ;;  %v158_v21 = vpack.c.bf16 %v78_v12, %v77_v11  ;;  %v60_v22 = vld [vmem:[%s738_s1 + $0x88] sm:$0xff]  ;;  %v141_v32 = vpack.c.bf16 %v44_v15, %v43_v14 }
  0x15   :  { %216 = vmatpush.bf16.msra.mxu1 %v152_v57  ;;  %v121_v23 = vld [vmem:[%s738_s1 + $0x270] sm:$0xff]  ;;  %v122_v24 = vld [vmem:[%s738_s1 + $0x278] sm:$0xff]  ;;  %v75_v27 = vld [vmem:[%s738_s1 + $0x100] sm:$0xff]  ;;  %v166_v28 = vpack.c.bf16 %v94_v19, %v93_v18  ;;  %v149_v37 = vpack.c.bf16 %v60_v22, %v59_v17 }
  0x16   :  { %230 = vmatpush.bf16.msra.mxu2 %v160_v58  ;;  %v137_v25 = vld [vmem:[%s738_s1 + $0x2f0] sm:$0xff]  ;;  %v138_v26 = vld [vmem:[%s738_s1 + $0x2f8] sm:$0xff]  ;;  %v76_v29 = vld [vmem:[%s738_s1 + $0x108] sm:$0xff]  ;;  %v180_v38 = vpack.c.bf16 %v122_v24, %v121_v23 }
  0x17   :  { %244 = vmatpush.bf16.msra.mxu3 %v168_v1  ;;  %v91_v30 = vld [vmem:[%s738_s1 + $0x180] sm:$0xff]  ;;  %v92_v31 = vld [vmem:[%s738_s1 + $0x188] sm:$0xff]  ;;  %v29_v36 = vld [vmem:[%s737_s0 + $0x38] sm:$0xff]  ;;  %v188_v43 = vpack.c.bf16 %v138_v26, %v137_v25  ;;  %v157_v44 = vpack.c.bf16 %v76_v29, %v75_v27 }
  0x18   :  { %203 = vmatpush.bf16.msra.mxu0 %v143_v2  ;;  %v119_v33 = vld [vmem:[%s738_s1 + $0x260] sm:$0xff]  ;;  %v120_v34 = vld [vmem:[%s738_s1 + $0x268] sm:$0xff]  ;;  %v24_v40 = vld [vmem:[%s737_s0 + $0x10] sm:$0xff]  ;;  %v165_v48 = vpack.c.bf16 %v92_v31, %v91_v30 }
  0x19   :  { %217 = vmatpush.bf16.msra.mxu1 %v151_v5  ;;  %v22_v35 = vld [vmem:[%s737_s0] sm:$0xff]  ;;  %v23_v41 = vld [vmem:[%s737_s0 + $0x8] sm:$0xff]  ;;  %v25_v51 = vld [vmem:[%s737_s0 + $0x18] sm:$0xff]  ;;  %v179_v55 = vpack.c.bf16 %v120_v34, %v119_v33 }
  0x1a   :  { %231 = vmatpush.bf16.msra.mxu2 %v159_v6  ;;  %v135_v39 = vld [vmem:[%s738_s1 + $0x2e0] sm:$0xff]  ;;  %v31_v45 = vld [vmem:[%s737_s0 + $0x48] sm:$0xff]  ;;  %v36_v50 = vpack.c.bf16 %v29_v36, %v22_v35  ;;  %v32_v52 = vld [vmem:[%s737_s0 + $0x50] sm:$0xff] }
  0x1b   :  { %245 = vmatpush.bf16.msra.mxu3 %v167_v13  ;;  %v30_v42 = vld [vmem:[%s737_s0 + $0x40] sm:$0xff]  ;;  %v140_v47 = vld [vmem:[%s738_s1 + $0x308] sm:$0xff]  ;;  %v38_v56 = vpack.c.bf16 %v31_v45, %v24_v40  ;;  %v39_v58 = vpack.c.bf16 %v32_v52, %v25_v51  ;;  %v117_v59 = vld [vmem:[%s738_s1 + $0x250] sm:$0xff] }
  0x1c   :  { %204 = vmatpush.bf16.msra.mxu0 %v142_v16  ;;  %v139_v46 = vld [vmem:[%s738_s1 + $0x300] sm:$0xff]  ;;  %v136_v49 = vld [vmem:[%s738_s1 + $0x2e8] sm:$0xff]  ;;  %v37_v53 = vpack.c.bf16 %v30_v42, %v23_v41  ;;  %v118_v60 = vld [vmem:[%s738_s1 + $0x258] sm:$0xff] }
  0x1d   :  { %218 = vmatpush.bf16.msra.mxu1 %v150_v20  ;;  %v189_v54 = vpack.c.bf16 %v140_v47, %v139_v46  ;;  %v187_v57 = vpack.c.bf16 %v136_v49, %v135_v39  ;;  %v133_v61 = vld [vmem:[%s738_s1 + $0x2d0] sm:$0xff]  ;;  %v134_v62 = vld [vmem:[%s738_s1 + $0x2d8] sm:$0xff]  ;;  %v178_v63 = vpack.c.bf16 %v118_v60, %v117_v59  ;;  %v115_v1 = vld [vmem:[%s738_s1 + $0x240] sm:$0xff] }
  0x1e   :  { %232 = vmatpush.bf16.msra.mxu2 %v158_v21  ;;  %v186_v0 = vpack.c.bf16 %v134_v62, %v133_v61  ;;  %v116_v2 = vld [vmem:[%s738_s1 + $0x248] sm:$0xff]  ;;  %v131_v3 = vld [vmem:[%s738_s1 + $0x2c0] sm:$0xff]  ;;  %v113_v7 = vld [vmem:[%s738_s1 + $0x230] sm:$0xff] }
  0x1f   :  { %246 = vmatpush.bf16.msra.mxu3 %v166_v28  ;;  %v132_v4 = vld [vmem:[%s738_s1 + $0x2c8] sm:$0xff]  ;;  %v177_v5 = vpack.c.bf16 %v116_v2, %v115_v1  ;;  %v114_v8 = vld [vmem:[%s738_s1 + $0x238] sm:$0xff]  ;;  %v129_v9 = vld [vmem:[%s738_s1 + $0x2b0] sm:$0xff] }
  0x20   :  { %205 = vmatpush.bf16.msra.mxu0 %v141_v32  ;;  %v185_v6 = vpack.c.bf16 %v132_v4, %v131_v3  ;;  %v130_v10 = vld [vmem:[%s738_s1 + $0x2b8] sm:$0xff]  ;;  %v176_v11 = vpack.c.bf16 %v114_v8, %v113_v7  ;;  %v111_v12 = vld [vmem:[%s738_s1 + $0x220] sm:$0xff]  ;;  %v112_v14 = vld [vmem:[%s738_s1 + $0x228] sm:$0xff] }
  0x21   :  { %219 = vmatpush.bf16.msra.mxu1 %v149_v37  ;;  %v184_v13 = vpack.c.bf16 %v130_v10, %v129_v9  ;;  %v28_v15 = vld [vmem:[%s737_s0 + $0x30] sm:$0xff]  ;;  %v35_v16 = vld [vmem:[%s737_s0 + $0x68] sm:$0xff]  ;;  %v127_v17 = vld [vmem:[%s738_s1 + $0x2a0] sm:$0xff]  ;;  %v175_v19 = vpack.c.bf16 %v112_v14, %v111_v12  ;;  %v309_v10 = vstv %s741_s4 }
  0x22   :  { %233 = vmatpush.bf16.msra.mxu2 %v157_v44  ;;  %v128_v18 = vld [vmem:[%s738_s1 + $0x2a8] sm:$0xff]  ;;  %v42_v20 = vpack.c.bf16 %v35_v16, %v28_v15  ;;  %v109_v22 = vld [vmem:[%s738_s1 + $0x210] sm:$0xff]  ;;  %v110_v23 = vld [vmem:[%s738_s1 + $0x218] sm:$0xff] }
  0x23   :  { %247 = vmatpush.bf16.msra.mxu3 %v165_v48  ;;  %206 = vmatmul.bf16.vlgmr.msra.gmra.mxu0 %v36_v50  ;;  %v183_v21 = vpack.c.bf16 %v128_v18, %v127_v17  ;;  %v125_v24 = vld [vmem:[%s738_s1 + $0x290] sm:$0xff]  ;;  %v126_v25 = vld [vmem:[%s738_s1 + $0x298] sm:$0xff]  ;;  %v174_v26 = vpack.c.bf16 %v110_v23, %v109_v22  ;;  %v107_v28 = vld [vmem:[%s738_s1 + $0x200] sm:$0xff] }
  0x24   :  { %254 = vmatpush.bf16.msrb.mxu0 %v180_v38  ;;  %220 = vmatmul.bf16.vlgmr.msra.gmra.mxu1 %v37_v53  ;;  %v182_v27 = vpack.c.bf16 %v126_v25, %v125_v24  ;;  %v108_v29 = vld [vmem:[%s738_s1 + $0x208] sm:$0xff]  ;;  %v123_v30 = vld [vmem:[%s738_s1 + $0x280] sm:$0xff]  ;;  %v33_v34 = vld [vmem:[%s737_s0 + $0x58] sm:$0xff] }
  0x25   :  { %268 = vmatpush.bf16.msrb.mxu1 %v188_v43  ;;  %234 = vmatmul.bf16.vlgmr.msra.gmra.mxu2 %v38_v56  ;;  %v124_v31 = vld [vmem:[%s738_s1 + $0x288] sm:$0xff]  ;;  %v173_v32 = vpack.c.bf16 %v108_v29, %v107_v28  ;;  %v26_v33 = vld [vmem:[%s737_s0 + $0x20] sm:$0xff] }
  0x26   :  { %289 = vmatpush.bf16.msrb.mxu2 %v189_v54  ;;  %248 = vmatmul.bf16.vlgmr.msra.gmra.mxu3 %v39_v58  ;;  %v181_v35 = vpack.c.bf16 %v124_v31, %v123_v30  ;;  %v27_v36 = vld [vmem:[%s737_s0 + $0x28] sm:$0xff]  ;;  %v34_v37 = vld [vmem:[%s737_s0 + $0x60] sm:$0xff]  ;;  %v40_v38 = vpack.c.bf16 %v33_v34, %v26_v33 }
  0x27   :  { %v41_v39 = vpack.c.bf16 %v34_v37, %v27_v36  ;;  %v357_v42 = vld [vmem:[%s739_s2] ss:$0 sm:$0xff] }
  0x28   :  { %255 = vmatpush.bf16.msrb.mxu0 %v179_v55  ;;  %v358_v62 = vld [vmem:[%s740_s3] ss:$0 sm:$0xff] }
  0x29   :  { %269 = vmatpush.bf16.msrb.mxu1 %v187_v57 }
  0x2c   :  { %256 = vmatpush.bf16.msrb.mxu0 %v178_v63 }
  0x2d   :  { %270 = vmatpush.bf16.msrb.mxu1 %v186_v0 }
  0x30   :  { %257 = vmatpush.bf16.msrb.mxu0 %v177_v5 }
  0x31   :  { %271 = vmatpush.bf16.msrb.mxu1 %v185_v6 }
  0x34   :  { %258 = vmatpush.bf16.msrb.mxu0 %v176_v11 }
  0x35   :  { %272 = vmatpush.bf16.msrb.mxu1 %v184_v13  ;;  %356 = vmatmul.msk.bf16.vlgmr.msrb.gmra.mxu2 %vm194_vm0, %v42_v20 }
  0x38   :  { %259 = vmatpush.bf16.msrb.mxu0 %v175_v19 }
  0x39   :  { %273 = vmatpush.bf16.msrb.mxu1 %v183_v21 }
  0x3c   :  { %260 = vmatpush.bf16.msrb.mxu0 %v174_v26 }
  0x3d   :  { %274 = vmatpush.bf16.msrb.mxu1 %v182_v27 }
  0x40   :  { %261 = vmatpush.bf16.msrb.mxu0 %v173_v32 }
  0x41   :  { %275 = vmatpush.bf16.msrb.mxu1 %v181_v35 }
  0x43   :  { %262 = vmatmul.bf16.vlgmr.msrb.gmra.mxu0 %v40_v38 }
  0x44   :  { %276 = vmatmul.bf16.vlgmr.msrb.gmra.mxu1 %v41_v39 }
  0xa0   :  { %v207_v40 = vpop.f32.mrf.mxu0 }
  0xa1   :  { %v221_v43 = vpop.f32.mrf.mxu1  ;;  %v208_v44 = vadd.f32 %v357_v42, %v207_v40 }
  0xa3   :  { %v222_v45 = vadd.f32 %v221_v43, %v208_v44 }
  0xa8   :  { %v235_v41 = vpop.f32.mrf.mxu2  ;;  %v209_v46 = vpop.f32.mrf.mxu0 }
  0xa9   :  { %v223_v48 = vpop.f32.mrf.mxu1  ;;  %v249_v49 = vpop.f32.mrf.mxu3  ;;  %v236_v50 = vadd.f32 %v235_v41, %v222_v45  ;;  %v210_v51 = vadd.f32 %v357_v42, %v209_v46 }
  0xab   :  { %v250_v52 = vadd.f32 %v249_v49, %v236_v50  ;;  %v224_v53 = vadd.f32 %v223_v48, %v210_v51 }
  0xb0   :  { %v237_v47 = vpop.f32.mrf.mxu2 }
  0xb1   :  { %v238_v58 = vadd.f32 %v237_v47, %v224_v53  ;;  %v251_v60 = vpop.f32.mrf.mxu3 }
  0xb3   :  { %v252_v63 = vadd.f32 %v251_v60, %v238_v58 }
  0xb8   :  { %v291_v57 = vpop.f32.mrf.mxu2 }
  0xc0   :  { %v263_v54 = vpop.f32.mrf.mxu0  ;;  %v293_v6 = vpop.f32.mrf.mxu2 }
  0xc1   :  { %v264_v55 = vadd.f32 %v263_v54, %v250_v52  ;;  %v277_v56 = vpop.f32.mrf.mxu1 }
  0xc3   :  { %v278_v59 = vadd.f32 %v277_v56, %v264_v55 }
  0xc5   :  { %v292_v61 = vadd.f32 %v291_v57, %v278_v59 }
  0xc7   :  { %v296_v0 = vmax.f32 %v292_v61, 0.0 }
  0xc8   :  { %v265_v1 = vpop.f32.mrf.mxu0 }
  0xc9   :  { %v266_v2 = vadd.f32 %v265_v1, %v252_v63  ;;  %v302_v3 = vmul.f32 %v358_v62, %v296_v0  ;;  %v279_v4 = vpop.f32.mrf.mxu1 }
  0xcb   :  { %v280_v5 = vadd.f32 %v279_v4, %v266_v2  ;;  %304 = vadd.xlane.f32.xlu0 %v302_v3 }
  0xcd   :  { %v294_v7 = vadd.f32 %v293_v6, %v280_v5 }
  0xcf   :  { %v297_v8 = vmax.f32 %v294_v7, 0.0 }
  0xd1   :  { %v303_v9 = vmul.f32 %v358_v62, %v297_v8 }
  0xd3   :  { %306 = vadd.xlane.f32.xlu0 %v303_v9 }
 0x13e   :  { %v305_v11 = vpop.xlane.xlu0 %304 }
 0x13f   :  { %v310_v12 = vadd.f32 %v309_v10, %v305_v11 }
 0x141   :  { %313 = vst.msk [vmem:[#allocation3] sm:$0xff] %vm312_vm1, %v310_v12 }
 0x146   :  { %v307_v13 = vpop.xlane.xlu0 %306 }
 0x148   :  { %v345_v14 = vld [vmem:[#allocation3] sm:$0xff] }
 0x149   :  { %346 = vst [vmem:[%s742_s5] sm:$0xff] %v345_v14 }

</bundles_post_ra>
